<compile_context>
chip_gen: v7x
topology: tpu7x:2x2x1
jax: 0.10.0
libtpu: 0.0.40
codegen_flags: <defaults>
</compile_context>

<pallas_src>
import jax
import jax.numpy as jnp
from jax.experimental import pallas as pl
from jax.experimental.pallas import tpu as pltpu


def _learnable_sigmoid_kernel(params_ref, x_ref, o_ref):
    # params_ref: SMEM (2,) f32 = [w, 1 + exp(w)]
    # x_ref / o_ref: VMEM tiles (tile_rows, lanes) in the input's native dtype.
    w = params_ref[0]
    scale = params_ref[1]
    x = x_ref[...].astype(jnp.float32)
    # Exact torch form; overflow of exp saturates correctly in f32 (-> 0).
    o_ref[...] = (scale / (1.0 + jnp.exp(w - x))).astype(o_ref.dtype)


def _sublane_rows(dtype):
    """Packed-sublane-native row multiple for the I/O dtype."""
    return {4: 8, 2: 16, 1: 32}.get(jnp.dtype(dtype).itemsize, 8)


def _chip_target_tile_bytes():
    """Per-buffer row-tile byte budget keyed off the TPU generation."""
    try:
        kind = jax.devices()[0].device_kind.lower()
    except Exception:
        return 2 * 1024 * 1024
    if "v7" in kind or "7x" in kind:
        return 6 * 1024 * 1024      # v7x: 3.2 TB/s HBM; 4 x 6 MiB << 64 MiB VMEM
    if "v6" in kind:
        return 4 * 1024 * 1024      # v6e: ~86% of roofline knee
    return 2 * 1024 * 1024          # v5e & older: scoped VMEM default is 16 MiB


def _natural_2d_view(shape, itemsize, max_row_bytes=6 * 1024 * 1024):
    """Smallest trailing-dim collapse (rows, lanes) with lanes % 128 == 0."""
    total = 1
    for d in shape:
        total *= d
    if total == 0:
        return None
    lanes = 1
    for d in reversed(shape):
        lanes *= d
        if lanes % 128 == 0:
            if lanes * itemsize > max_row_bytes:
                return None         # a single row would blow the tile budget
            return total // lanes, lanes
    return None


def _pallas_apply(x2d, params, target_tile_bytes):
    rows, lanes = x2d.shape
    dtype = x2d.dtype
    itemsize = jnp.dtype(dtype).itemsize
    sublane = _sublane_rows(dtype)

    row_bytes = lanes * itemsize
    budget_rows = max(sublane, int(target_tile_bytes // row_bytes))
    tile_rows = max(sublane, (budget_rows // sublane) * sublane)
    if rows >= 2 * sublane:
        # Keep >= 2 grid steps so "parallel" can shard across both v7x TCs.
        half = max(sublane, ((rows // 2) // sublane) * sublane)
        tile_rows = min(tile_rows, half)
    tile_rows = min(tile_rows, rows)  # block == full extent is always legal

    grid = (pl.cdiv(rows, tile_rows),)
    block_bytes = tile_rows * lanes * itemsize
    # 2x double-buffering for input + output, plus headroom; capped well under
    # v7x's 64 MiB physical VMEM.
    vmem_limit = min(48 * 1024 * 1024,
                     max(16 * 1024 * 1024, 4 * block_bytes + 4 * 1024 * 1024))

    return pl.pallas_call(
        _learnable_sigmoid_kernel,
        out_shape=jax.ShapeDtypeStruct((rows, lanes), dtype),
        grid=grid,
        in_specs=[
            pl.BlockSpec(memory_space=pltpu.MemorySpace.SMEM),   # scalar params
            pl.BlockSpec((tile_rows, lanes), lambda i: (i, 0)),  # input tile
        ],
        out_specs=pl.BlockSpec((tile_rows, lanes), lambda i: (i, 0)),
        compiler_params=pltpu.CompilerParams(
            dimension_semantics=("parallel",),
            vmem_limit_bytes=int(vmem_limit),
        ),
        cost_estimate=pl.CostEstimate(
            flops=3 * rows * lanes,
            transcendentals=rows * lanes,
            bytes_accessed=2 * rows * lanes * itemsize,
        ),
    )(params, x2d)


def learnable_sigmoid(x, weight):
    """(1 + exp(w)) / (1 + exp(w - x)) elementwise via a Pallas TPU kernel."""
    orig_shape = x.shape
    dtype = x.dtype
    total = x.size
    itemsize = jnp.dtype(dtype).itemsize

    # Scalar parameters, computed once: [w, 1 + exp(w)].
    w = weight.reshape(()).astype(jnp.float32)
    scale = 1.0 + jnp.exp(w)
    params = jnp.stack([w, scale])

    if total == 0:
        return (scale / (1.0 + jnp.exp(w - x.astype(jnp.float32)))).astype(dtype)

    tile_bytes = _chip_target_tile_bytes()

    # Fast path: trailing dims already collapse to a multiple-of-128 lane
    # width -> no pad, no relayout repack, no output slice.
    view = _natural_2d_view(orig_shape, itemsize)
    if view is not None:
        rows, lanes = view
        out2d = _pallas_apply(x.reshape(rows, lanes), params, tile_bytes)
        return out2d.reshape(orig_shape)

    # Rare path (no 128-aligned trailing collapse): run the kernel over the
    # 128-aligned bulk prefix; the < 128-element tail is cheap in plain jnp.
    x_flat = x.reshape(-1)
    bulk = (total // 128) * 128
    pieces = []
    if bulk > 0:
        bulk_out = _pallas_apply(x_flat[:bulk].reshape(bulk // 128, 128),
                                 params, tile_bytes)
        pieces.append(bulk_out.reshape(-1))
    if bulk < total:
        tail = x_flat[bulk:].astype(jnp.float32)
        pieces.append((scale / (1.0 + jnp.exp(w - tail))).astype(dtype))
    out_flat = pieces[0] if len(pieces) == 1 else jnp.concatenate(pieces)
    return out_flat.reshape(orig_shape)


if __name__ == "__main__":
    key = jax.random.PRNGKey(0)

    # Parameter init matches torch: ones of shape (1, 1, 1).
    weight = jnp.ones((1, 1, 1), dtype=jnp.float32)

    # Small NCHW-style input consistent with usage inside an attention module.
    x = jax.random.normal(key, (2, 4, 16, 16), dtype=jnp.float32)

    out = jax.block_until_ready(learnable_sigmoid(x, weight))

    # Reference in plain JAX (f32).
    ref = (1.0 + jnp.exp(weight)) / (1.0 + jnp.exp(weight - x))
    assert out.shape == x.shape
    assert out.dtype == x.dtype
    assert jnp.allclose(out, ref, atol=1e-6, rtol=1e-6), "f32 mismatch vs reference"

    # Native-dtype (bf16) I/O path: kernel streams bf16 HBM<->VMEM, math in f32.
    x_bf16 = x.astype(jnp.bfloat16)
    out_bf16 = jax.block_until_ready(learnable_sigmoid(x_bf16, weight))
    ref_bf16 = ((1.0 + jnp.exp(weight)) /
                (1.0 + jnp.exp(weight - x_bf16.astype(jnp.float32))))
    assert out_bf16.dtype == jnp.bfloat16
    assert jnp.allclose(out_bf16.astype(jnp.float32), ref_bf16,
                        atol=5e-2, rtol=5e-2), "bf16 mismatch vs reference"

    # Odd, non-128-collapsible shape exercises the bulk+tail fallback.
    x_odd = jax.random.normal(jax.random.PRNGKey(1), (3, 7, 13), dtype=jnp.float32)
    out_odd = jax.block_until_ready(learnable_sigmoid(x_odd, weight))
    ref_odd = (1.0 + jnp.exp(weight)) / (1.0 + jnp.exp(weight - x_odd))
    assert jnp.allclose(out_odd, ref_odd, atol=1e-6, rtol=1e-6), "odd-shape mismatch"

    print("KERNEL_OK")
</pallas_src>

<mosaic_0001>
module attributes {stable_mosaic.version = 11 : i64} {
  func.func @_learnable_sigmoid_kernel(%arg0: i32, %arg1: memref<2xf32, #tpu.memory_space<smem>>, %arg2: memref<8x256xf32, #tpu.memory_space<vmem>>, %arg3: memref<8x256xf32, #tpu.memory_space<vmem>>) attributes {dimension_semantics = [#tpu.dimension_semantics<parallel>], iteration_bounds = array<i64: 1>, scalar_prefetch = 0 : i64, scratch_operands = 0 : i64, tpu.core_type = #tpu.core_type<tc>, window_params = [{transform_indices = @transform_0, window_bounds = array<i64: 2>}, {transform_indices = @transform_1, window_bounds = array<i64: 8, 256>}, {transform_indices = @transform_2, window_bounds = array<i64: 8, 256>}]} {
    %c0 = arith.constant 0 : index
    %0 = memref.load %arg1[%c0] : memref<2xf32, #tpu.memory_space<smem>>
    %c1 = arith.constant 1 : index
    %1 = memref.load %arg1[%c1] : memref<2xf32, #tpu.memory_space<smem>>
    %c0_0 = arith.constant 0 : index
    %c0_1 = arith.constant 0 : index
    %2 = vector.load %arg2[%c0_0, %c0_1] : memref<8x256xf32, #tpu.memory_space<vmem>>, vector<8x256xf32>
    %3 = vector.broadcast %0 : f32 to vector<8x256xf32>
    %4 = arith.subf %3, %2 : vector<8x256xf32>
    %5 = math.exp %4 : vector<8x256xf32>
    %cst = arith.constant 1.000000e+00 : f32
    %6 = vector.broadcast %cst : f32 to vector<8x256xf32>
    %7 = arith.addf %6, %5 : vector<8x256xf32>
    %8 = vector.broadcast %1 : f32 to vector<8x256xf32>
    %9 = arith.divf %8, %7 : vector<8x256xf32>
    %c0_2 = arith.constant 0 : index
    %c0_3 = arith.constant 0 : index
    %10 = vector.load %arg3[%c0_2, %c0_3] : memref<8x256xf32, #tpu.memory_space<vmem>>, vector<8x256xf32>
    tpu.vector_store %arg3[%c0_2, %c0_3], %9 {strides = array<i32>} : memref<8x256xf32, #tpu.memory_space<vmem>>, vector<8x256xf32>,
    return
  }
  func.func @transform_0(%arg0: i32) -> i32 {
    %c0_i32 = arith.constant 0 : i32
    %c0_i32_0 = arith.constant 0 : i32
    return %c0_i32 : i32
  }
  func.func @transform_1(%arg0: i32) -> (i32, i32) {
    %c0_i32 = arith.constant 0 : i32
    %c0_i32_0 = arith.constant 0 : i32
    return %arg0, %c0_i32 : i32, i32
  }
  func.func @transform_2(%arg0: i32) -> (i32, i32) {
    %c0_i32 = arith.constant 0 : i32
    %c0_i32_0 = arith.constant 0 : i32
    return %arg0, %c0_i32 : i32, i32
  }
}

</mosaic_0001>

<bundles_post_ra>
// kernel: tpu_custom_call.1
= control target key start
LH: loop header
LB: loop body
LE: loop exit
PB: predicated region body
PF: predicated region fallthrough
CT: control target
= control target key end

     0   :  { %7 = vsyncpa [#allocation5], 0  ;;  %s197_s0 = inlined_call_operand.hbm [shape: f32[2], index: 0, kind: input, shape index: {}]   ;;  %s198_s1 = inlined_call_operand.hbm [shape: f32[8,256], index: 1, kind: input, shape index: {}]   ;;  %s199_s2 = inlined_call_operand.hbm [shape: f32[8,256], index: 2, kind: output, shape index: {}]  }
   0x1   :  { %8 = vsyncpa [#allocation3], 0 }
   0x2   :  { %9 = vsyncpa [#allocation4], 0  ;;  %s83_s11 = scalar_lea.hbm %s197_s0, 16 }
   0x3   :  { %p84_p0 = scmp.ne.s32.totalorder %s197_s0, %s83_s11  ;;  %p87_p1 = scmp.lt.u32.totalorder %s83_s11, %s197_s0 }
   0x5   :  { %p89_p2 = pnand %p87_p1, %p84_p0 }
   0x7   :  { %92 = shalt.err (!%p89_p2)
}
   0x8   :  { %s143_s16 = smov [#allocation2]   ;;  %s144_s19 = smov [#allocation6]  }
   0x9   :  { %17 = dma.hbm_to_smem %s197_s0, 16, %s143_s16, [#allocation5]  }
   0xa   :  { %s24_s20 = sshll.u32 %s144_s19, 4  ;;  %s93_s23 = scalar_lea.hbm %s198_s1, 256  ;;  %s25_s20 = int_to_ptr.vmem [resolvable:$true] %s24_s20 }
   0xb   :  { %p94_p3 = scmp.ne.s32.totalorder %s198_s1, %s93_s23  ;;  %p97_p4 = scmp.lt.u32.totalorder %s93_s23, %s198_s1 }
   0xd   :  { %p99_p5 = pnand %p97_p4, %p94_p3 }
   0xf   :  { %102 = shalt.err (!%p99_p5)
}
  0x10   :  { %s103_s28 = scalar_lea.vmem %s25_s20, 256  ;;  %p108_p7 = scmp.lt.s32.totalorder %s25_s20, %s25_s20 }
  0x11   :  { %p104_p6 = scmp.ne.s32.totalorder %s25_s20, %s103_s28  ;;  %p109_p8 = scmp.lt.s32.totalorder %s103_s28, %s103_s28 }
  0x13   :  { %p110_p9 = por %p109_p8, %p108_p7 }
  0x15   :  { %p111_p10 = pnand %p110_p9, %p104_p6 }
  0x17   :  { %114 = shalt.err (!%p111_p10)
}
  0x18   :  { %27 = dma.hbm_to_vmem [thread:$0]  %s198_s1, 256, %s25_s20, [#allocation3]  }
  0x19   :  { %137 = dma.done.wait [#allocation5], 16  }
  0x1a   :  { %138 = vsyncadd [#allocation5], 4294967280 }
  0x1b   :  { %139 = dma.done.wait [#allocation3], 256  }
  0x1c   :  { %140 = vsyncadd [#allocation3], 4294967040 }
  0x1d   :  { %34 = sfence }
  0x1e   :  { %s35_s30 = sld [smem:[#allocation2]]  ;;  %v37_v0 = vld [vmem:[#allocation6] sm:$0xff]  ;;  %v38_v1 = vld [vmem:[#allocation6 + $0x8] sm:$0xff]  ;;  %s71_s1 = sld [smem:[#allocation2 + $0x1]] }
  0x1f   :  { %s145_s3 = smov [#allocation7]  }
  0x20   :  { %s61_s4 = sshll.u32 %s145_s3, 4  ;;  %s62_s4 = int_to_ptr.vmem [resolvable:$true] %s61_s4 }
  0x21   :  { %s115_s5 = scalar_lea.vmem %s62_s4, 256  ;;  %p120_p12 = scmp.lt.s32.totalorder %s62_s4, %s62_s4 }
  0x22   :  { %p116_p11 = scmp.ne.s32.totalorder %s62_s4, %s115_s5  ;;  %p121_p13 = scmp.lt.s32.totalorder %s115_s5, %s115_s5 }
  0x24   :  { %v39_v2 = vstv %s35_s30  ;;  %v48_v11 = vstv %s71_s1  ;;  %p122_p0 = por %p121_p13, %p120_p12 }
  0x25   :  { %v40_v3 = vsub.f32 %v39_v2, %v37_v0  ;;  %v41_v4 = vsub.f32 %v39_v2, %v38_v1 }
  0x26   :  { %p123_p1 = pnand %p122_p0, %p116_p11 }
  0x27   :  { %v42_v5 = vmul.f32 1.442695, %v40_v3  ;;  %v44_v6 = vmul.f32 1.442695, %v41_v4 }
  0x29   :  { %75 = vpow2.f32 %v42_v5 }
  0x2a   :  { %77 = vpow2.f32 %v44_v6 }
  0x33   :  { %v76_v7 = vpop.eup %75 }
  0x34   :  { %v78_v8 = vpop.eup %77  ;;  %v46_v9 = vadd.f32 1.0, %v76_v7 }
  0x35   :  { %v47_v10 = vadd.f32 1.0, %v78_v8 }
  0x36   :  { %79 = vrcp.f32 %v46_v9 }
  0x37   :  { %81 = vrcp.f32 %v47_v10 }
  0x40   :  { %v80_v12 = vpop.eup %79 }
  0x41   :  { %v82_v13 = vpop.eup %81  ;;  %v50_v14 = vmul.f32 %v80_v12, %v48_v11 }
  0x42   :  { %v52_v15 = vmul.f32 %v82_v13, %v48_v11 }
  0x43   :  { %53 = vst [vmem:[#allocation7] sm:$0xff] %v50_v14 }
  0x44   :  { %54 = vst [vmem:[#allocation7 + $0x8] sm:$0xff] %v52_v15 }
  0x45   :  { %126 = shalt.err (!%p123_p1)
}
  0x46   :  { %s127_s8 = scalar_lea.hbm %s199_s2, 256 }
  0x47   :  { %p128_p2 = scmp.ne.s32.totalorder %s199_s2, %s127_s8  ;;  %p131_p3 = scmp.lt.u32.totalorder %s127_s8, %s199_s2 }
  0x49   :  { %p133_p4 = pnand %p131_p3, %p128_p2 }
  0x4b   :  { %136 = shalt.err (!%p133_p4)
}
  0x4c   :  { %64 = dma.vmem_to_hbm [thread:$0]  %s62_s4, 256, %s199_s2, [#allocation4]  }
  0x4d   :  { %141 = dma.done.wait [#allocation4], 256  }
  0x4e   :  { %142 = vsyncadd [#allocation4], 4294967040 }
  0x4f   :  { %68 = vsyncpa [#allocation3], 1 }
  0x50   :  { %69 = vsyncpa [#allocation4], 1 }
  0x51   :  { %70 = vsyncpa [#allocation5], 1 }

</bundles_post_ra>
